<compile_context>
chip_gen: v7x
topology: tpu7x:2x2x1
jax: 0.10.0
libtpu: 0.0.40
codegen_flags: <defaults>
</compile_context>

<pallas_src>
import math

import jax
import jax.numpy as jnp
from jax.experimental import pallas as pl
from jax.experimental.pallas import tpu as pltpu


def _frozen_bn1d_kernel(x_ref, p_ref, o_ref):
    # p_ref is (2, W) f32: row 0 = scale, row 1 = fused bias.
    scale = p_ref[0:1, :]                      # (1, W) f32
    bias = p_ref[1:2, :]                       # (1, W) f32
    # x * scale promotes to f32 if x is bf16; single cast back on the store.
    o_ref[...] = (x_ref[...] * scale + bias).astype(o_ref.dtype)


_W_MAX = 16384  # widest repacked lane width considered (elements)


def _choose_layout(N, C):
    """Return (rows, width, reps, pad_elems) for a lane-dense repack, or None."""
    if C % 128 == 0:
        return None                            # already lane-aligned
    lcm = C * 128 // math.gcd(C, 128)
    if lcm > _W_MAX:
        # Awkward channel count; keep full-C (masked) tiles.  Correct but slow.
        return None
    total = N * C
    width = max(lcm, (min(_W_MAX, total) // lcm) * lcm)
    rows = -(-total // width)                  # ceil
    pad = rows * width - total
    return rows, width, width // C, pad


def _vmem_budget():
    """(pipeline_bytes, vmem_limit_bytes) sized for the current TPU generation."""
    phys = 64 << 20                            # conservative default (v7x per-TC)
    try:
        info = pltpu.get_tpu_info()
        phys = int(getattr(info, "vmem_capacity_bytes", phys))
    except Exception:
        pass
    # Double-buffered (x tile + out tile) footprint: ~24 MiB, never more than
    # half of physical VMEM (v5e/v6e: 24 of 128 MiB; v7x: 24 of 64 MiB).
    pipeline = min(24 << 20, phys // 2)
    # Scoped limit requested from Mosaic: headroom over the pipeline, capped at
    # half of physical VMEM (32 MiB on all three generations).
    limit = min(phys // 2, max(32 << 20, pipeline + (8 << 20)))
    return pipeline, limit


def _choose_block_rows(rows, width, itemsize, pipeline_bytes):
    """Sublane-aligned streaming tile height: byte-budgeted, >= 8 grid steps."""
    sub = 8 if itemsize >= 4 else (16 if itemsize == 2 else 32)
    if rows <= sub:
        return rows                            # one tile == full array (allowed)
    # pipeline = 2 buffers x (x tile + out tile) => 4 live tiles of this size.
    tile_bytes = max(1, pipeline_bytes // 4)   # ~6 MiB per tile at the default
    row_bytes = max(1, width * itemsize)
    cap = max(sub, (tile_bytes // row_bytes) // sub * sub)
    # >= 8 grid steps when rows allow: each v7x TensorCore then gets >= 4 tiles
    # -> double-buffering on both cores; also helps v5e/v6e pipelining.
    min_steps = 8
    per_step = ((rows + min_steps - 1) // min_steps + sub - 1) // sub * sub
    return max(sub, min(cap, per_step))


def frozen_batch_norm_1d(x, weight, bias, running_mean, running_var,
                         eps=1e-5, block_rows=None):
    """x: (N, C); weight/bias/running_mean/running_var: (C,)."""
    N, C = x.shape

    # Frozen affine, computed once in f32 (keeps eps from rounding away in bf16).
    w32 = weight.astype(jnp.float32)
    b32 = bias.astype(jnp.float32)
    rm32 = running_mean.astype(jnp.float32)
    rv32 = running_var.astype(jnp.float32)
    scale = w32 * jax.lax.rsqrt(rv32 + jnp.float32(eps))
    fused_bias = b32 - rm32 * scale

    layout = _choose_layout(N, C)
    if layout is None:
        rows, width, reps, pad = N, C, 1, 0
        x2 = x
    else:
        rows, width, reps, pad = layout
        flat = x.reshape(-1)
        if pad:
            flat = jnp.pad(flat, (0, pad))     # wrapper-side pad; sliced off below
        x2 = flat.reshape(rows, width)         # lane-dense repack (pure layout)

    params = jnp.stack([jnp.tile(scale, reps),
                        jnp.tile(fused_bias, reps)])   # (2, width) f32

    pipeline_bytes, vmem_limit = _vmem_budget()
    itemsize = jnp.dtype(x.dtype).itemsize
    if block_rows is None:
        block_rows = _choose_block_rows(rows, width, itemsize, pipeline_bytes)
    grid = (pl.cdiv(rows, block_rows),)

    out2 = pl.pallas_call(
        _frozen_bn1d_kernel,
        out_shape=jax.ShapeDtypeStruct((rows, width), x.dtype),
        grid_spec=pltpu.PrefetchScalarGridSpec(
            num_scalar_prefetch=0,
            grid=grid,
            in_specs=[
                pl.BlockSpec((block_rows, width), lambda i: (i, 0)),
                pl.BlockSpec((2, width), lambda i: (0, 0)),   # resident params
            ],
            out_specs=pl.BlockSpec((block_rows, width), lambda i: (i, 0)),
        ),
        # TODO(synk): verify in an xprof trace that the plain "parallel" axis
        # actually lands on both v7x TensorCores; if not, switch this axis to
        # pltpu.CORE_PARALLEL.
        compiler_params=pltpu.CompilerParams(
            dimension_semantics=("parallel",),
            vmem_limit_bytes=vmem_limit),
    )(x2, params)

    if layout is None:
        return out2
    if pad:
        return out2.reshape(-1)[:N * C].reshape(N, C)
    return out2.reshape(N, C)


class FrozenBatchNorm1d:
    """JAX mirror of the frozen PyTorch module: fixed buffers, no training."""

    def __init__(self, n, eps=1e-5):
        self.weight = jnp.ones((n,), jnp.float32)
        self.bias = jnp.zeros((n,), jnp.float32)
        self.running_mean = jnp.zeros((n,), jnp.float32)
        self.running_var = jnp.ones((n,), jnp.float32)
        self.eps = eps

    def __call__(self, x):
        return frozen_batch_norm_1d(x, self.weight, self.bias,
                                    self.running_mean, self.running_var,
                                    eps=self.eps)


def _reference(x, bn):
    scale = bn.weight * jax.lax.rsqrt(bn.running_var + bn.eps)
    bias = bn.bias - bn.running_mean * scale
    return x * scale.reshape(1, -1) + bias.reshape(1, -1)


if __name__ == "__main__":
    key = jax.random.PRNGKey(0)
    kx, kw, kb, km, kv, kx2 = jax.random.split(key, 6)

    # Case 1: the usual small (N, C) input.
    N, C = 8, 32
    x = jax.random.normal(kx, (N, C), jnp.float32)

    bn = FrozenBatchNorm1d(C)
    # Deterministic, non-trivial buffer values (synthetic — not a checkpoint).
    bn.weight = jax.random.normal(kw, (C,), jnp.float32) * 0.5 + 1.0
    bn.bias = jax.random.normal(kb, (C,), jnp.float32) * 0.1
    bn.running_mean = jax.random.normal(km, (C,), jnp.float32) * 0.2
    bn.running_var = jax.random.uniform(kv, (C,), jnp.float32,
                                        minval=0.5, maxval=1.5)

    out = jax.block_until_ready(bn(x))
    ref = _reference(x, bn)
    assert out.shape == (N, C) and out.dtype == x.dtype
    assert jnp.allclose(out, ref, atol=1e-5, rtol=1e-5)

    # Case 2: awkward (N, C) that exercises the pad-and-slice repack path.
    N2, C2 = 10, 24
    x2 = jax.random.normal(kx2, (N2, C2), jnp.float32)
    bn2 = FrozenBatchNorm1d(C2)
    bn2.weight = jnp.linspace(0.5, 1.5, C2, dtype=jnp.float32)
    bn2.bias = jnp.linspace(-0.1, 0.1, C2, dtype=jnp.float32)
    bn2.running_mean = jnp.linspace(-0.2, 0.2, C2, dtype=jnp.float32)
    bn2.running_var = jnp.linspace(0.6, 1.4, C2, dtype=jnp.float32)

    out2 = jax.block_until_ready(bn2(x2))
    ref2 = _reference(x2, bn2)
    assert out2.shape == (N2, C2) and out2.dtype == x2.dtype
    assert jnp.allclose(out2, ref2, atol=1e-5, rtol=1e-5)

    print("KERNEL_OK")
</pallas_src>

<mosaic_0001>
module attributes {stable_mosaic.version = 11 : i64} {
  func.func @_frozen_bn1d_kernel(%arg0: i32, %arg1: memref<1x256xf32, #tpu.memory_space<vmem>>, %arg2: memref<2x256xf32, #tpu.memory_space<vmem>>, %arg3: memref<1x256xf32, #tpu.memory_space<vmem>>) attributes {dimension_semantics = [#tpu.dimension_semantics<parallel>], iteration_bounds = array<i64: 1>, scalar_prefetch = 0 : i64, scratch_operands = 0 : i64, tpu.core_type = #tpu.core_type<tc>, window_params = [{transform_indices = @transform_0, window_bounds = array<i64: 1, 256>}, {pipeline_mode = #tpu.pipeline_mode<synchronous>, transform_indices = @transform_1, window_bounds = array<i64: 2, 256>}, {transform_indices = @transform_2, window_bounds = array<i64: 1, 256>}]} {
    %c0 = arith.constant 0 : index
    %c0_0 = arith.constant 0 : index
    %0 = vector.load %arg2[%c0, %c0_0] : memref<2x256xf32, #tpu.memory_space<vmem>>, vector<1x256xf32>
    %c1 = arith.constant 1 : index
    %c0_1 = arith.constant 0 : index
    %1 = vector.load %arg2[%c1, %c0_1] : memref<2x256xf32, #tpu.memory_space<vmem>>, vector<1x256xf32>
    %c0_2 = arith.constant 0 : index
    %c0_3 = arith.constant 0 : index
    %2 = vector.load %arg1[%c0_2, %c0_3] : memref<1x256xf32, #tpu.memory_space<vmem>>, vector<1x256xf32>
    %3 = arith.mulf %2, %0 : vector<1x256xf32>
    %4 = arith.addf %3, %1 : vector<1x256xf32>
    %c0_4 = arith.constant 0 : index
    %c0_5 = arith.constant 0 : index
    %5 = vector.load %arg3[%c0_4, %c0_5] : memref<1x256xf32, #tpu.memory_space<vmem>>, vector<1x256xf32>
    tpu.vector_store %arg3[%c0_4, %c0_5], %4 {strides = array<i32>} : memref<1x256xf32, #tpu.memory_space<vmem>>, vector<1x256xf32>,
    return
  }
  func.func @transform_0(%arg0: i32) -> (i32, i32) {
    %c0_i32 = arith.constant 0 : i32
    %c0_i32_0 = arith.constant 0 : i32
    return %arg0, %c0_i32 : i32, i32
  }
  func.func @transform_1(%arg0: i32) -> (i32, i32) {
    %c0_i32 = arith.constant 0 : i32
    %c0_i32_0 = arith.constant 0 : i32
    %c0_i32_1 = arith.constant 0 : i32
    return %c0_i32, %c0_i32_0 : i32, i32
  }
  func.func @transform_2(%arg0: i32) -> (i32, i32) {
    %c0_i32 = arith.constant 0 : i32
    %c0_i32_0 = arith.constant 0 : i32
    return %arg0, %c0_i32 : i32, i32
  }
}

</mosaic_0001>

<bundles_post_ra>
// kernel: tpu_custom_call.1
= control target key start
LH: loop header
LB: loop body
LE: loop exit
PB: predicated region body
PF: predicated region fallthrough
CT: control target
= control target key end

     0   :  { %7 = vsyncpa [#allocation3], 0  ;;  %s192_s0 = inlined_call_operand.hbm [shape: f32[1,256], index: 0, kind: input, shape index: {}]   ;;  %s193_s1 = inlined_call_operand.hbm [shape: f32[2,256], index: 1, kind: input, shape index: {}]   ;;  %s194_s2 = inlined_call_operand.hbm [shape: f32[1,256], index: 2, kind: output, shape index: {}]  }
   0x1   :  { %8 = vsyncpa [#allocation6], 0 }
   0x2   :  { %9 = vsyncpa [#allocation4], 0  ;;  %s138_s9 = smov [#allocation2]   ;;  %s139_s11 = smov [#allocation5]  }
   0x3   :  { %s16_s10 = sshll.u32 %s138_s9, 4  ;;  %s26_s12 = sshll.u32 %s139_s11, 4  ;;  %s17_s10 = int_to_ptr.vmem [resolvable:$true] %s16_s10  ;;  %s27_s12 = int_to_ptr.vmem [resolvable:$true] %s26_s12 }
   0x4   :  { %s66_s15 = scalar_lea.hbm %s192_s0, 32 }
   0x5   :  { %p67_p0 = scmp.ne.s32.totalorder %s192_s0, %s66_s15  ;;  %p70_p1 = scmp.lt.u32.totalorder %s66_s15, %s192_s0 }
   0x7   :  { %p72_p2 = pnand %p70_p1, %p67_p0 }
   0x9   :  { %75 = shalt.err (!%p72_p2)
}
   0xa   :  { %s76_s20 = scalar_lea.vmem %s17_s10, 32  ;;  %p81_p4 = scmp.lt.s32.totalorder %s17_s10, %s17_s10 }
   0xb   :  { %p77_p3 = scmp.ne.s32.totalorder %s17_s10, %s76_s20  ;;  %p82_p5 = scmp.lt.s32.totalorder %s76_s20, %s76_s20 }
   0xd   :  { %p83_p6 = por %p82_p5, %p81_p4 }
   0xf   :  { %p84_p7 = pnand %p83_p6, %p77_p3 }
  0x11   :  { %87 = shalt.err (!%p84_p7)
}
  0x12   :  { %19 = dma.hbm_to_vmem [thread:$0]  %s192_s0, 32, %s17_s10, [#allocation3]  }
  0x13   :  { %s88_s25 = scalar_lea.hbm %s193_s1, 64 }
  0x14   :  { %p89_p8 = scmp.ne.s32.totalorder %s193_s1, %s88_s25  ;;  %p92_p9 = scmp.lt.u32.totalorder %s88_s25, %s193_s1 }
  0x16   :  { %p94_p10 = pnand %p92_p9, %p89_p8 }
  0x18   :  { %97 = shalt.err (!%p94_p10)
}
  0x19   :  { %s98_s30 = scalar_lea.vmem %s27_s12, 64  ;;  %p103_p12 = scmp.lt.s32.totalorder %s27_s12, %s27_s12 }
  0x1a   :  { %p99_p11 = scmp.ne.s32.totalorder %s27_s12, %s98_s30  ;;  %p104_p13 = scmp.lt.s32.totalorder %s98_s30, %s98_s30 }
  0x1c   :  { %p105_p0 = por %p104_p13, %p103_p12 }
  0x1e   :  { %p106_p1 = pnand %p105_p0, %p99_p11 }
  0x20   :  { %109 = shalt.err (!%p106_p1)
}
  0x21   :  { %29 = dma.hbm_to_vmem [thread:$0]  %s193_s1, 64, %s27_s12, [#allocation6]  }
  0x22   :  { %132 = dma.done.wait [#allocation3], 32  }
  0x23   :  { %133 = vsyncadd [#allocation3], 4294967264 }
  0x24   :  { %134 = dma.done.wait [#allocation6], 64  }
  0x25   :  { %135 = vsyncadd [#allocation6], 4294967232  ;;  %v42_v0 = vlaneseq  ;;  %v36_v1 = vld [vmem:[#allocation5] ss:$2 sm:$0x3]  ;;  %s140_s4 = smov [#allocation7]  }
  0x26   :  { %v38_v2 = vld [vmem:[#allocation5 + $0x1] ss:$2 sm:$0x3]  ;;  %v39_v3 = vld [vmem:[#allocation2] sm:$0x3]  ;;  %s53_s5 = sshll.u32 %s140_s4, 4  ;;  %s54_s5 = int_to_ptr.vmem [resolvable:$true] %s53_s5 }
  0x27   :  { %v40_v4 = vmul.f32 %v39_v3, %v36_v1  ;;  %vm44_vm0 = vcmp.lt.s32.totalorder %v42_v0, 256  ;;  %s110_s6 = scalar_lea.vmem %s54_s5, 32  ;;  %p115_p3 = scmp.lt.s32.totalorder %s54_s5, %s54_s5 }
  0x28   :  { %p111_p2 = scmp.ne.s32.totalorder %s54_s5, %s110_s6  ;;  %p116_p4 = scmp.lt.s32.totalorder %s110_s6, %s110_s6 }
  0x29   :  { %v41_v5 = vadd.f32 %v40_v4, %v38_v2 }
  0x2a   :  { %p117_p5 = por %p116_p4, %p115_p3 }
  0x2b   :  { %46 = vst.msk [vmem:[#allocation7] sm:$0x3] %vm44_vm0, %v41_v5 }
  0x2c   :  { %p118_p6 = pnand %p117_p5, %p111_p2 }
  0x2e   :  { %121 = shalt.err (!%p118_p6)
}
  0x2f   :  { %s122_s8 = scalar_lea.hbm %s194_s2, 32 }
  0x30   :  { %p123_p7 = scmp.ne.s32.totalorder %s194_s2, %s122_s8  ;;  %p126_p8 = scmp.lt.u32.totalorder %s122_s8, %s194_s2 }
  0x32   :  { %p128_p9 = pnand %p126_p8, %p123_p7 }
  0x34   :  { %131 = shalt.err (!%p128_p9)
}
  0x35   :  { %56 = dma.vmem_to_hbm [thread:$0]  %s54_s5, 32, %s194_s2, [#allocation4]  }
  0x36   :  { %136 = dma.done.wait [#allocation4], 32  }
  0x37   :  { %137 = vsyncadd [#allocation4], 4294967264 }
  0x38   :  { %60 = vsyncpa [#allocation3], 1 }
  0x39   :  { %61 = vsyncpa [#allocation6], 1 }
  0x3a   :  { %62 = vsyncpa [#allocation4], 1 }

</bundles_post_ra>
